<compile_context>
chip_gen: v7x
topology: tpu7x:2x2x1
jax: 0.10.0
libtpu: 0.0.40
codegen_flags: <defaults>
</compile_context>

<pallas_src>
import functools

import jax
import jax.numpy as jnp
from jax import lax
from jax.experimental import pallas as pl
from jax.experimental.pallas import tpu as pltpu

# Module hyper-parameter defaults (from __init__)
KERNEL_TYPE = "rbf"
Z_VAR = 2.0
BETA = 5.0
ALPHA = -0.5
REG_WEIGHT = 100.0


def _info_vae_loss_kernel(recons_ref, x_ref, lat_ref, out_ref, mse_acc,
                          *, n, d, total_elems, z_var, beta, alpha, reg_weight):
    step = pl.program_id(0)
    last = pl.num_programs(0) - 1

    # ---- Reconstruction MSE: running sum of squared error over row tiles ----
    @pl.when(step == 0)
    def _():
        mse_acc[0] = 0.0

    diff = recons_ref[...].astype(jnp.float32) - x_ref[...].astype(jnp.float32)
    mse_acc[0] = mse_acc[0] + jnp.sum(diff * diff)

    # ---- Latent terms + final combination: only on the last grid step ----
    @pl.when(step == last)
    def _():
        recons_loss = mse_acc[0] * (1.0 / float(total_elems))

        # Packed latent slab rows: [0,n) prior_z, [n,2n) z, [2n,3n) mu, [3n,4n) log_var.
        # Keep MXU-friendly dtypes (bf16/f32) native; widen anything else.
        if lat_ref.dtype == jnp.bfloat16 or lat_ref.dtype == jnp.float32:
            s = lat_ref[...]
        else:
            s = lat_ref[...].astype(jnp.float32)

        m = 4 * n
        # Gram matrix over ALL 4n rows (mu / log_var rows are masked out below).
        g = lax.dot_general(s, s, (((1,), (1,)), ((), ())),
                            preferred_element_type=jnp.float32)       # (4n, 4n)

        row_id = lax.broadcasted_iota(jnp.int32, (m, m), 0)
        col_id = lax.broadcasted_iota(jnp.int32, (m, m), 1)
        eye = (row_id == col_id).astype(jnp.float32)
        gd = g * eye
        norms_col = jnp.sum(gd, axis=1, keepdims=True)                # ||s_i||^2 (column)
        norms_row = jnp.sum(gd, axis=0, keepdims=True)                # ||s_j||^2 (row)
        sq = norms_col + norms_row - 2.0 * g                          # ||s_i - s_j||^2

        # PyTorch compute_rbf: exp(-mean_d(diff^2) / sigma), sigma = 2*D*z_var.
        sigma = 2.0 * float(d) * z_var
        k = jnp.exp(sq * (-1.0 / (float(d) * sigma)))

        row_p = row_id < n
        col_p = col_id < n
        row_z = jnp.logical_and(row_id >= n, row_id < 2 * n)
        col_z = jnp.logical_and(col_id >= n, col_id < 2 * n)
        zero = jnp.zeros_like(k)
        inv_n2 = 1.0 / float(n * n)
        pp = jnp.sum(jnp.where(jnp.logical_and(row_p, col_p), k, zero)) * inv_n2
        zz = jnp.sum(jnp.where(jnp.logical_and(row_z, col_z), k, zero)) * inv_n2
        pz = jnp.sum(jnp.where(jnp.logical_and(row_p, col_z), k, zero)) * inv_n2
        mmd = pp + zz - 2.0 * pz

        # ---- KLD: mean_b( -0.5 * sum_d(1 + logvar - mu^2 - exp(logvar)) ) ----
        mu = lat_ref[2 * n:3 * n, :].astype(jnp.float32)
        lv = lat_ref[3 * n:4 * n, :].astype(jnp.float32)
        kld_terms = 1.0 + lv - mu * mu - jnp.exp(lv)
        kld_loss = -0.5 * jnp.sum(kld_terms) * (1.0 / float(n))

        # ---- Weighted total loss ----
        # TODO(synk): the real module's kld_weight comes from M_N kwargs during
        # training; the provided forward uses 1/batch_size, replicated here.
        kld_weight = 1.0 / float(n)
        bias_corr = float(n * (n - 1))
        loss = (beta * recons_loss
                + (1.0 - alpha) * kld_weight * kld_loss
                + (alpha + reg_weight - 1.0) / bias_corr * mmd)

        out_ref[0] = loss
        out_ref[1] = recons_loss
        out_ref[2] = mmd
        out_ref[3] = -kld_loss


def _pick_block_rows(rows: int, max_rows: int = 512) -> int:
    """Whole array if it is small; otherwise the largest multiple-of-8 divisor."""
    if rows <= max_rows:
        return rows
    best = None
    r = 8
    while r <= max_rows:
        if rows % r == 0:
            best = r
        r += 8
    return best if best is not None else rows


def info_vae_loss(recons, x, z, prior_z, mu, log_var, *,
                  kernel_type=KERNEL_TYPE, z_var=Z_VAR, beta=BETA,
                  alpha=ALPHA, reg_weight=REG_WEIGHT):
    """Pallas implementation of InfoVaeLoss.forward. Returns the same dict."""
    if kernel_type != "rbf":
        # TODO(synk): 'imq' kernel branch not implemented (module default is 'rbf').
        raise NotImplementedError("only kernel_type='rbf' is implemented")

    n = x.shape[0]
    d = z.shape[1]
    if n < 2:
        raise ValueError("InfoVaeLoss requires batch_size >= 2 (bias_corr = N*(N-1)).")

    total = x.size
    # Lane-dense reshape of the image tensors: full (8,128) tiles when possible.
    if total % 128 == 0:
        rows, lanes = total // 128, 128
    else:
        rows, lanes = n, total // n
    recons2 = recons.reshape(rows, lanes)
    x2 = x.reshape(rows, lanes)

    block_rows = _pick_block_rows(rows)
    grid = (rows // block_rows,)

    # Pack the four (N, D) latents into one (4N, D) slab -> one DMA, full tiles.
    lat = jnp.concatenate([prior_z, z, mu, log_var], axis=0)

    kernel = functools.partial(
        _info_vae_loss_kernel, n=n, d=d, total_elems=int(total),
        z_var=z_var, beta=beta, alpha=alpha, reg_weight=reg_weight)

    out = pl.pallas_call(
        kernel,
        grid=grid,
        in_specs=[
            pl.BlockSpec((block_rows, lanes), lambda i: (i, 0)),
            pl.BlockSpec((block_rows, lanes), lambda i: (i, 0)),
            pl.BlockSpec((4 * n, d), lambda i: (0, 0)),
        ],
        out_specs=pl.BlockSpec(memory_space=pltpu.MemorySpace.SMEM),
        out_shape=jax.ShapeDtypeStruct((4,), jnp.float32),
        scratch_shapes=[pltpu.SMEM((1,), jnp.float32)],
        compiler_params=pltpu.CompilerParams(
            dimension_semantics=("arbitrary",)),
    )(recons2, x2, lat)

    return {"loss": out[0], "Reconstruction_Loss": out[1],
            "MMD": out[2], "KLD": out[3]}


def info_vae_loss_ref(recons, x, z, prior_z, mu, log_var, *,
                      z_var=Z_VAR, beta=BETA, alpha=ALPHA, reg_weight=REG_WEIGHT):
    """Pure-JAX reference mirroring the PyTorch module."""
    n = x.shape[0]
    d = z.shape[1]
    recons_loss = jnp.mean((recons - x) ** 2)
    sigma = 2.0 * d * z_var

    def rbf(a, b):
        sq = jnp.mean((a[:, None, :] - b[None, :, :]) ** 2, axis=-1)
        return jnp.exp(-sq / sigma)

    mmd = rbf(prior_z, prior_z).mean() + rbf(z, z).mean() - 2.0 * rbf(prior_z, z).mean()
    kld_loss = jnp.mean(-0.5 * jnp.sum(1.0 + log_var - mu ** 2 - jnp.exp(log_var), axis=1))
    kld_weight = 1.0 / n
    bias_corr = n * (n - 1)
    loss = (beta * recons_loss
            + (1.0 - alpha) * kld_weight * kld_loss
            + (alpha + reg_weight - 1.0) / bias_corr * mmd)
    return {"loss": loss, "Reconstruction_Loss": recons_loss,
            "MMD": mmd, "KLD": -kld_loss}


if __name__ == "__main__":
    key = jax.random.PRNGKey(0)
    k1, k2, k3, k4, k5, k6 = jax.random.split(key, 6)

    N, C, H, W, D = 2, 4, 16, 16, 128
    x = jax.random.normal(k1, (N, C, H, W), jnp.float32)
    recons = x + 0.1 * jax.random.normal(k2, (N, C, H, W), jnp.float32)
    mu = jax.random.normal(k3, (N, D), jnp.float32)
    log_var = 0.1 * jax.random.normal(k4, (N, D), jnp.float32)
    z = mu + jnp.exp(0.5 * log_var) * jax.random.normal(k5, (N, D), jnp.float32)
    # torch.rand_like(z) equivalent: uniform [0, 1), drawn deterministically host-side.
    prior_z = jax.random.uniform(k6, (N, D), jnp.float32)

    out = info_vae_loss(recons, x, z, prior_z, mu, log_var)
    jax.block_until_ready(out)

    ref = info_vae_loss_ref(recons, x, z, prior_z, mu, log_var)
    for name in ("loss", "Reconstruction_Loss", "MMD", "KLD"):
        assert jnp.isfinite(out[name]), name
        assert jnp.allclose(out[name], ref[name], rtol=3e-4, atol=1e-4), (
            name, out[name], ref[name])

    print("KERNEL_OK")
</pallas_src>

<mosaic_0001>
module attributes {stable_mosaic.version = 11 : i64} {
  func.func @_info_vae_loss_kernel(%arg0: i32, %arg1: memref<16x128xf32, #tpu.memory_space<vmem>>, %arg2: memref<16x128xf32, #tpu.memory_space<vmem>>, %arg3: memref<8x128xf32, #tpu.memory_space<vmem>>, %arg4: memref<4xf32, #tpu.memory_space<smem>>, %arg5: memref<1xf32, #tpu.memory_space<smem>>) attributes {dimension_semantics = [#tpu.dimension_semantics<arbitrary>], iteration_bounds = array<i64: 1>, scalar_prefetch = 0 : i64, scratch_operands = 1 : i64, tpu.core_type = #tpu.core_type<tc>, window_params = [{transform_indices = @transform_0, window_bounds = array<i64: 16, 128>}, {transform_indices = @transform_1, window_bounds = array<i64: 16, 128>}, {pipeline_mode = #tpu.pipeline_mode<synchronous>, transform_indices = @transform_2, window_bounds = array<i64: 8, 128>}, {transform_indices = @transform_3, window_bounds = array<i64: 4>}]} {
    %c0_i32 = arith.constant 0 : i32
    %0 = arith.cmpi eq, %arg0, %c0_i32 : i32
    %1 = arith.extui %0 : i1 to i32
    %c0_i32_0 = arith.constant 0 : i32
    %2 = arith.cmpi ne, %1, %c0_i32_0 : i32
    scf.if %2 {
      %cst_8 = arith.constant 0.000000e+00 : f32
      %c0_9 = arith.constant 0 : index
      %17 = memref.load %arg5[%c0_9] : memref<1xf32, #tpu.memory_space<smem>>
      memref.store %cst_8, %arg5[%c0_9] : memref<1xf32, #tpu.memory_space<smem>>
    } else {
    }
    %c0 = arith.constant 0 : index
    %c0_1 = arith.constant 0 : index
    %3 = vector.load %arg1[%c0, %c0_1] : memref<16x128xf32, #tpu.memory_space<vmem>>, vector<16x128xf32>
    %c0_2 = arith.constant 0 : index
    %c0_3 = arith.constant 0 : index
    %4 = vector.load %arg2[%c0_2, %c0_3] : memref<16x128xf32, #tpu.memory_space<vmem>>, vector<16x128xf32>
    %5 = arith.subf %3, %4 : vector<16x128xf32>
    %c0_4 = arith.constant 0 : index
    %6 = memref.load %arg5[%c0_4] : memref<1xf32, #tpu.memory_space<smem>>
    %7 = arith.mulf %5, %5 : vector<16x128xf32>
    %8 = vector.shape_cast %7 : vector<16x128xf32> to vector<1x16x128xf32>
    %cst = arith.constant dense<0.000000e+00> : vector<1xf32>
    %9 = vector.multi_reduction <add>, %8, %cst [1, 2] : vector<1x16x128xf32> to vector<1xf32>
    %10 = vector.shape_cast %9 : vector<1xf32> to vector<1x1x1xf32>
    %11 = vector.extract %10[0, 0, 0] : f32 from vector<1x1x1xf32>
    %12 = arith.addf %6, %11 : f32
    %c0_5 = arith.constant 0 : index
    %13 = memref.load %arg5[%c0_5] : memref<1xf32, #tpu.memory_space<smem>>
    memref.store %12, %arg5[%c0_5] : memref<1xf32, #tpu.memory_space<smem>>
    %c0_i32_6 = arith.constant 0 : i32
    %14 = arith.cmpi eq, %arg0, %c0_i32_6 : i32
    %15 = arith.extui %14 : i1 to i32
    %c0_i32_7 = arith.constant 0 : i32
    %16 = arith.cmpi ne, %15, %c0_i32_7 : i32
    scf.if %16 {
      %c0_8 = arith.constant 0 : index
      %17 = memref.load %arg5[%c0_8] : memref<1xf32, #tpu.memory_space<smem>>
      %cst_9 = arith.constant 4.8828125E-4 : f32
      %18 = arith.mulf %17, %cst_9 : f32
      %c0_10 = arith.constant 0 : index
      %c0_11 = arith.constant 0 : index
      %19 = vector.load %arg3[%c0_10, %c0_11] : memref<8x128xf32, #tpu.memory_space<vmem>>, vector<8x128xf32>
      %cst_12 = arith.constant dense<0.000000e+00> : vector<8x8xf32>
      %20 = tpu.matmul %19, %19, %cst_12 {dimension_numbers = #tpu.dot_dimension_numbers<[1], [1], [0], [0], [0, 0, 1, 0], [], []>} : vector<8x128xf32>, vector<8x128xf32>, vector<8x8xf32> -> vector<8x8xf32>
      %21 = tpu.iota {dimensions = array<i32: 0>} : vector<8x8xi32>
      %22 = tpu.iota {dimensions = array<i32: 1>} : vector<8x8xi32>
      %23 = arith.cmpi eq, %21, %22 : vector<8x8xi32>
      %24 = arith.extui %23 : vector<8x8xi1> to vector<8x8xi32>
      %25 = arith.sitofp %24 : vector<8x8xi32> to vector<8x8xf32>
      %26 = arith.mulf %20, %25 : vector<8x8xf32>
      %cst_13 = arith.constant dense<0.000000e+00> : vector<8xf32>
      %27 = vector.multi_reduction <add>, %26, %cst_13 [1] : vector<8x8xf32> to vector<8xf32>
      %28 = vector.shape_cast %27 : vector<8xf32> to vector<8x1xf32>
      %cst_14 = arith.constant dense<0.000000e+00> : vector<8xf32>
      %29 = vector.multi_reduction <add>, %26, %cst_14 [0] : vector<8x8xf32> to vector<8xf32>
      %30 = vector.shape_cast %29 : vector<8xf32> to vector<1x8xf32>
      %31 = vector.broadcast %28 : vector<8x1xf32> to vector<8x8xf32>
      %32 = vector.broadcast %30 : vector<1x8xf32> to vector<8x8xf32>
      %33 = arith.addf %31, %32 : vector<8x8xf32>
      %cst_15 = arith.constant 2.000000e+00 : f32
      %34 = vector.broadcast %cst_15 : f32 to vector<8x8xf32>
      %35 = arith.mulf %34, %20 : vector<8x8xf32>
      %36 = arith.subf %33, %35 : vector<8x8xf32>
      %cst_16 = arith.constant -1.52587891E-5 : f32
      %37 = vector.broadcast %cst_16 : f32 to vector<8x8xf32>
      %38 = arith.mulf %36, %37 : vector<8x8xf32>
      %39 = math.exp %38 : vector<8x8xf32>
      %c2_i32 = arith.constant 2 : i32
      %40 = vector.broadcast %c2_i32 : i32 to vector<8x8xi32>
      %41 = arith.cmpi slt, %21, %40 : vector<8x8xi32>
      %c2_i32_17 = arith.constant 2 : i32
      %42 = vector.broadcast %c2_i32_17 : i32 to vector<8x8xi32>
      %43 = arith.cmpi slt, %22, %42 : vector<8x8xi32>
      %c2_i32_18 = arith.constant 2 : i32
      %44 = vector.broadcast %c2_i32_18 : i32 to vector<8x8xi32>
      %45 = arith.cmpi sge, %21, %44 : vector<8x8xi32>
      %c4_i32 = arith.constant 4 : i32
      %46 = vector.broadcast %c4_i32 : i32 to vector<8x8xi32>
      %47 = arith.cmpi slt, %21, %46 : vector<8x8xi32>
      %48 = arith.andi %45, %47 : vector<8x8xi1>
      %c2_i32_19 = arith.constant 2 : i32
      %49 = vector.broadcast %c2_i32_19 : i32 to vector<8x8xi32>
      %50 = arith.cmpi sge, %22, %49 : vector<8x8xi32>
      %c4_i32_20 = arith.constant 4 : i32
      %51 = vector.broadcast %c4_i32_20 : i32 to vector<8x8xi32>
      %52 = arith.cmpi slt, %22, %51 : vector<8x8xi32>
      %53 = arith.andi %50, %52 : vector<8x8xi1>
      %cst_21 = arith.constant 0.000000e+00 : f32
      %54 = vector.broadcast %cst_21 : f32 to vector<8x8xf32>
      %55 = arith.andi %41, %43 : vector<8x8xi1>
      %56 = arith.select %55, %39, %54 : vector<8x8xi1>, vector<8x8xf32>
      %57 = vector.shape_cast %56 : vector<8x8xf32> to vector<1x8x8xf32>
      %cst_22 = arith.constant dense<0.000000e+00> : vector<1xf32>
      %58 = vector.multi_reduction <add>, %57, %cst_22 [1, 2] : vector<1x8x8xf32> to vector<1xf32>
      %59 = vector.shape_cast %58 : vector<1xf32> to vector<1x1x1xf32>
      %60 = vector.extract %59[0, 0, 0] : f32 from vector<1x1x1xf32>
      %cst_23 = arith.constant 2.500000e-01 : f32
      %61 = arith.mulf %60, %cst_23 : f32
      %62 = arith.andi %48, %53 : vector<8x8xi1>
      %63 = arith.select %62, %39, %54 : vector<8x8xi1>, vector<8x8xf32>
      %64 = vector.shape_cast %63 : vector<8x8xf32> to vector<1x8x8xf32>
      %cst_24 = arith.constant dense<0.000000e+00> : vector<1xf32>
      %65 = vector.multi_reduction <add>, %64, %cst_24 [1, 2] : vector<1x8x8xf32> to vector<1xf32>
      %66 = vector.shape_cast %65 : vector<1xf32> to vector<1x1x1xf32>
      %67 = vector.extract %66[0, 0, 0] : f32 from vector<1x1x1xf32>
      %cst_25 = arith.constant 2.500000e-01 : f32
      %68 = arith.mulf %67, %cst_25 : f32
      %69 = arith.andi %41, %53 : vector<8x8xi1>
      %70 = arith.select %69, %39, %54 : vector<8x8xi1>, vector<8x8xf32>
      %71 = vector.shape_cast %70 : vector<8x8xf32> to vector<1x8x8xf32>
      %cst_26 = arith.constant dense<0.000000e+00> : vector<1xf32>
      %72 = vector.multi_reduction <add>, %71, %cst_26 [1, 2] : vector<1x8x8xf32> to vector<1xf32>
      %73 = vector.shape_cast %72 : vector<1xf32> to vector<1x1x1xf32>
      %74 = vector.extract %73[0, 0, 0] : f32 from vector<1x1x1xf32>
      %cst_27 = arith.constant 2.500000e-01 : f32
      %75 = arith.mulf %74, %cst_27 : f32
      %76 = arith.addf %61, %68 : f32
      %cst_28 = arith.constant 2.000000e+00 : f32
      %77 = arith.mulf %cst_28, %75 : f32
      %78 = arith.subf %76, %77 : f32
      %c4 = arith.constant 4 : index
      %c0_29 = arith.constant 0 : index
      %79 = vector.load %arg3[%c4, %c0_29] : memref<8x128xf32, #tpu.memory_space<vmem>>, vector<2x128xf32>
      %c6 = arith.constant 6 : index
      %c0_30 = arith.constant 0 : index
      %80 = vector.load %arg3[%c6, %c0_30] : memref<8x128xf32, #tpu.memory_space<vmem>>, vector<2x128xf32>
      %cst_31 = arith.constant 1.000000e+00 : f32
      %81 = vector.broadcast %cst_31 : f32 to vector<2x128xf32>
      %82 = arith.addf %81, %80 : vector<2x128xf32>
      %83 = arith.mulf %79, %79 : vector<2x128xf32>
      %84 = arith.subf %82, %83 : vector<2x128xf32>
      %85 = math.exp %80 : vector<2x128xf32>
      %86 = arith.subf %84, %85 : vector<2x128xf32>
      %87 = vector.shape_cast %86 : vector<2x128xf32> to vector<1x2x128xf32>
      %cst_32 = arith.constant dense<0.000000e+00> : vector<1xf32>
      %88 = vector.multi_reduction <add>, %87, %cst_32 [1, 2] : vector<1x2x128xf32> to vector<1xf32>
      %89 = vector.shape_cast %88 : vector<1xf32> to vector<1x1x1xf32>
      %90 = vector.extract %89[0, 0, 0] : f32 from vector<1x1x1xf32>
      %cst_33 = arith.constant -5.000000e-01 : f32
      %91 = arith.mulf %cst_33, %90 : f32
      %cst_34 = arith.constant 5.000000e-01 : f32
      %92 = arith.mulf %91, %cst_34 : f32
      %cst_35 = arith.constant 5.000000e+00 : f32
      %93 = arith.mulf %cst_35, %18 : f32
      %cst_36 = arith.constant 7.500000e-01 : f32
      %94 = arith.mulf %cst_36, %92 : f32
      %95 = arith.addf %93, %94 : f32
      %cst_37 = arith.constant 4.925000e+01 : f32
      %96 = arith.mulf %cst_37, %78 : f32
      %97 = arith.addf %95, %96 : f32
      %c0_38 = arith.constant 0 : index
      %98 = memref.load %arg4[%c0_38] : memref<4xf32, #tpu.memory_space<smem>>
      memref.store %97, %arg4[%c0_38] : memref<4xf32, #tpu.memory_space<smem>>
      %c1 = arith.constant 1 : index
      %99 = memref.load %arg4[%c1] : memref<4xf32, #tpu.memory_space<smem>>
      memref.store %18, %arg4[%c1] : memref<4xf32, #tpu.memory_space<smem>>
      %c2 = arith.constant 2 : index
      %100 = memref.load %arg4[%c2] : memref<4xf32, #tpu.memory_space<smem>>
      memref.store %78, %arg4[%c2] : memref<4xf32, #tpu.memory_space<smem>>
      %cst_39 = arith.constant 0.000000e+00 : f32
      %101 = arith.subf %cst_39, %92 : f32
      %c3 = arith.constant 3 : index
      %102 = memref.load %arg4[%c3] : memref<4xf32, #tpu.memory_space<smem>>
      memref.store %101, %arg4[%c3] : memref<4xf32, #tpu.memory_space<smem>>
    } else {
    }
    return
  }
  func.func @transform_0(%arg0: i32) -> (i32, i32) {
    %c0_i32 = arith.constant 0 : i32
    %c0_i32_0 = arith.constant 0 : i32
    return %arg0, %c0_i32 : i32, i32
  }
  func.func @transform_1(%arg0: i32) -> (i32, i32) {
    %c0_i32 = arith.constant 0 : i32
    %c0_i32_0 = arith.constant 0 : i32
    return %arg0, %c0_i32 : i32, i32
  }
  func.func @transform_2(%arg0: i32) -> (i32, i32) {
    %c0_i32 = arith.constant 0 : i32
    %c0_i32_0 = arith.constant 0 : i32
    %c0_i32_1 = arith.constant 0 : i32
    return %c0_i32, %c0_i32_0 : i32, i32
  }
  func.func @transform_3(%arg0: i32) -> i32 {
    %c0_i32 = arith.constant 0 : i32
    %c0_i32_0 = arith.constant 0 : i32
    return %c0_i32 : i32
  }
}

</mosaic_0001>

<bundles_post_ra>
// kernel: tpu_custom_call.1
= control target key start
LH: loop header
LB: loop body
LE: loop exit
PB: predicated region body
PF: predicated region fallthrough
CT: control target
= control target key end

     0   :  { %8 = vsyncpa [#allocation4], 0  ;;  %s496_s0 = inlined_call_operand.hbm [shape: f32[16,128], index: 0, kind: input, shape index: {}]   ;;  %s497_s1 = inlined_call_operand.hbm [shape: f32[16,128], index: 1, kind: input, shape index: {}]   ;;  %s498_s2 = inlined_call_operand.hbm [shape: f32[8,128], index: 2, kind: input, shape index: {}]   ;;  %s499_s3 = inlined_call_operand.hbm [shape: f32[4], index: 3, kind: output, shape index: {}]  }
   0x1   :  { %9 = vsyncpa [#allocation7], 0 }
   0x2   :  { %10 = vsyncpa [#allocation5], 0  ;;  %s394_s12 = smov [#allocation6]   ;;  %s395_s14 = smov [#allocation3]  }
   0x3   :  { %s28_s13 = sshll.u32 %s394_s12, 4  ;;  %s16_s15 = sshll.u32 %s395_s14, 4  ;;  %s29_s13 = int_to_ptr.vmem [resolvable:$true] %s28_s13  ;;  %s422_s15 = int_to_ptr.vmem [resolvable:$true] %s16_s15 }
   0x4   :  { %s312_s18 = scalar_lea.hbm %s497_s1, 256 }
   0x5   :  { %p313_p0 = scmp.ne.s32.totalorder %s497_s1, %s312_s18  ;;  %p316_p1 = scmp.lt.u32.totalorder %s312_s18, %s497_s1 }
   0x7   :  { %p318_p2 = pnand %p316_p1, %p313_p0 }
   0x9   :  { %321 = shalt.err (!%p318_p2)
}
   0xa   :  { %s322_s23 = scalar_lea.vmem %s29_s13, 256  ;;  %p327_p4 = scmp.lt.s32.totalorder %s29_s13, %s29_s13 }
   0xb   :  { %p323_p3 = scmp.ne.s32.totalorder %s29_s13, %s322_s23  ;;  %p328_p5 = scmp.lt.s32.totalorder %s322_s23, %s322_s23 }
   0xd   :  { %p329_p6 = por %p328_p5, %p327_p4 }
   0xf   :  { %p330_p7 = pnand %p329_p6, %p323_p3 }
  0x11   :  { %333 = shalt.err (!%p330_p7)
}
  0x12   :  { %s396_s24 = smov 128   ;;  %s397_s25 = smov 8  }
  0x13   :  { %34 = dma.hbm_to_vmem [thread:$0]  %s497_s1, 256, %s29_s13, [#allocation7], %s396_s24, %s396_s24, %s397_s25  }
  0x14   :  { %s334_s30 = scalar_lea.hbm %s496_s0, 256 }
  0x15   :  { %p335_p8 = scmp.ne.s32.totalorder %s496_s0, %s334_s30  ;;  %p338_p9 = scmp.lt.u32.totalorder %s334_s30, %s496_s0 }
  0x17   :  { %p340_p10 = pnand %p338_p9, %p335_p8 }
  0x19   :  { %343 = shalt.err (!%p340_p10)
}
  0x1a   :  { %s344_s8 = scalar_lea.vmem %s422_s15, 256  ;;  %p349_p12 = scmp.lt.s32.totalorder %s422_s15, %s422_s15 }
  0x1b   :  { %p345_p11 = scmp.ne.s32.totalorder %s422_s15, %s344_s8  ;;  %p350_p13 = scmp.lt.s32.totalorder %s344_s8, %s344_s8 }
  0x1d   :  { %p351_p0 = por %p350_p13, %p349_p12 }
  0x1f   :  { %p352_p1 = pnand %p351_p0, %p345_p11 }
  0x21   :  { %355 = shalt.err (!%p352_p1)
}
  0x22   :  { %22 = dma.hbm_to_vmem [thread:$0]  %s496_s0, 256, %s422_s15, [#allocation4], %s396_s24, %s396_s24, %s397_s25  }
  0x23   :  { %s398_s10 = smov [#allocation8]   ;;  %s356_s14 = scalar_lea.hbm %s498_s2, 128 }
  0x24   :  { %s41_s11 = sshll.u32 %s398_s10, 4  ;;  %p357_p2 = scmp.ne.s32.totalorder %s498_s2, %s356_s14  ;;  %s42_s11 = int_to_ptr.vmem [resolvable:$true] %s41_s11 }
  0x25   :  { %p360_p3 = scmp.lt.u32.totalorder %s356_s14, %s498_s2 }
  0x27   :  { %p362_p4 = pnand %p360_p3, %p357_p2 }
  0x29   :  { %365 = shalt.err (!%p362_p4)
}
  0x2a   :  { %s366_s20 = scalar_lea.vmem %s42_s11, 128  ;;  %p371_p6 = scmp.lt.s32.totalorder %s42_s11, %s42_s11 }
  0x2b   :  { %p367_p5 = scmp.ne.s32.totalorder %s42_s11, %s366_s20  ;;  %p372_p7 = scmp.lt.s32.totalorder %s366_s20, %s366_s20 }
  0x2d   :  { %p373_p8 = por %p372_p7, %p371_p6 }
  0x2f   :  { %p374_p9 = pnand %p373_p8, %p367_p5 }
  0x31   :  { %377 = shalt.err (!%p374_p9)
}
  0x32   :  { %44 = dma.hbm_to_vmem [thread:$0]  %s498_s2, 128, %s42_s11, [#allocation7]  }
  0x33   :  { %388 = dma.done.wait [#allocation4], 256  }
  0x34   :  { %389 = vsyncadd [#allocation4], 4294967040 }
  0x35   :  { %390 = dma.done.wait [#allocation7], 384  }
  0x36   :  { %391 = vsyncadd [#allocation7], 4294966912  ;;  %v399_v0 = vmov 0.0   ;;  %vm400_vm0 = vmmov 0   ;;  %v87_v1 = vld [vmem:[#allocation8] sm:$0xff]  ;;  %v158_v2 = vlaneseq  ;;  %vm166_vm2 = vcmask 64512  }
  0x37   :  { %285 = vmatprep.subr.mxu0 %v399_v0  ;;  %287 = vmatprep.mubr.msk.f32.mxu0 %vm400_vm0, %v399_v0  ;;  %v60_v10 = vld [vmem:[#allocation3] sm:$0xff]  ;;  %v61_v11 = vld [vmem:[#allocation3 + $0x8] sm:$0xff]  ;;  %v62_v12 = vld [vmem:[#allocation6] sm:$0xff]  ;;  %vm240_vm14 = vcmask 1041408   ;;  %s378_s14 = scalar_lea.hbm %s499_s3, 16 }
  0x38   :  { %286 = vmatpush3.xpose.msra.mxu0 %v87_v1  ;;  %v159_v3 = vshrl.u32 %v158_v2, 7  ;;  %v161_v4 = vand.u32 127, %v158_v2  ;;  %v63_v13 = vld [vmem:[#allocation6 + $0x8] sm:$0xff]  ;;  %v64_v14 = vsub.f32 %v60_v10, %v62_v12  ;;  %v233_v29 = vld [vmem:[#allocation8 + $0x6] sm:$0x3]  ;;  %p379_p10 = scmp.ne.s32.totalorder %s499_s3, %s378_s14  ;;  %p382_p11 = scmp.lt.u32.totalorder %s378_s14, %s499_s3 }
  0x39   :  { %v65_v15 = vsub.f32 %v61_v11, %v63_v13  ;;  %v237_v31 = vmul.f32 1.442695, %v233_v29  ;;  %v232_v33 = vld [vmem:[#allocation8 + $0x4] sm:$0x3]  ;;  %v234_v35 = vadd.f32 1.0, %v233_v29 }
  0x3a   :  { %vm162_vm1 = vcmp.eq.s32.totalorder %v159_v3, %v161_v4  ;;  %v67_v16 = vmul.f32 %v64_v14, %v64_v14  ;;  %vm187_vm3 = vcmp.ge.s32.totalorder %v161_v4, 2  ;;  %vm188_vm4 = vcmp.lt.s32.totalorder %v161_v4, 4  ;;  %p384_p12 = pnand %p382_p11, %p379_p10 }
  0x3b   :  { %288 = vmatmul.mubr.f32.vlgmr.msra.gmra.mrb[0].mxu0 %v87_v1  ;;  %v282_v5 = vsel %vm162_vm1, 1.0, %v399_v0  ;;  %v68_v17 = vmul.f32 %v65_v15, %v65_v15  ;;  %vm182_vm5 = vcmp.lt.s32.totalorder %v159_v3, 2  ;;  %vm183_vm6 = vcmp.lt.s32.totalorder %v161_v4, 2  ;;  %vm466_vm9 = vmand %vm187_vm3, %vm188_vm4 }
  0x3c   :  { %vm184_vm7 = vcmp.ge.s32.totalorder %v159_v3, 2  ;;  %vm185_vm8 = vcmp.lt.s32.totalorder %v159_v3, 4  ;;  %vm190_vm10 = vmand %vm182_vm5, %vm183_vm6  ;;  %v235_v36 = vmul.f32 %v232_v33, %v232_v33 }
  0x3d   :  { %v69_v18 = vadd.f32 %v68_v17, %v67_v16  ;;  %vm186_vm11 = vmand %vm184_vm7, %vm185_vm8 }
  0x3e   :  { %vm216_vm12 = vmand %vm182_vm5, %vm466_vm9  ;;  %v236_v38 = vsub.f32 %v234_v35, %v235_v36 }
  0x3f   :  { %vm203_vm13 = vmand %vm186_vm11, %vm466_vm9 }
 0x10e   :  { %v154_v6 = vpop.f32.mrb[0].mxu0 }
 0x10f   :  { %v165_v7 = vmul.f32 %v282_v5, %v154_v6  ;;  %v289_v8 = vpop.f32.mrb[1].mxu0  ;;  %v177_v26 = vmul.f32 2.0, %v154_v6 }
 0x111   :  { %v167_v9 = vsel %vm166_vm2, %v165_v7, 0.0 }
 0x112   :  { %168 = vadd.xlane.f32.xlu0 %v167_v9  ;;  %v170_v19 = vrot.slane %v167_v9, 4 }
 0x114   :  { %v171_v20 = vadd.f32 %v170_v19, %v167_v9 }
 0x116   :  { %70 = vadd.xlane.f32.xlu0 %v69_v18  ;;  %v172_v21 = vrot.slane %v171_v20, 2 }
 0x118   :  { %v173_v22 = vadd.f32 %v172_v21, %v171_v20 }
 0x11a   :  { %v174_v23 = vrot.slane %v173_v22, 1 }
 0x11c   :  { %v175_v24 = vadd.f32 %v174_v23, %v173_v22 }
 0x19f   :  { %v169_v25 = vpop.xlane.xlu0 %168 }
 0x1a0   :  { %v176_v27 = vadd.f32 %v175_v24, %v169_v25 }
 0x1a2   :  { %v178_v28 = vsub.f32 %v176_v27, %v177_v26 }
 0x1a3   :  { %v71_v48 = vpop.xlane.xlu0 %70 }
 0x1a4   :  { %v179_v30 = vmul.f32 -1.5258789e-05, %v178_v28  ;;  %v72_v49 = vrot.slane %v71_v48, 4 }
 0x1a6   :  { %v180_v32 = vmul.f32 1.442695, %v179_v30  ;;  %v73_v50 = vadd.f32 %v72_v49, %v71_v48 }
 0x1a8   :  { %308 = vpow2.f32 %v180_v32  ;;  %v74_v51 = vrot.slane %v73_v50, 2 }
 0x1a9   :  { %310 = vpow2.f32 %v237_v31 }
 0x1aa   :  { %v75_v52 = vadd.f32 %v74_v51, %v73_v50 }
 0x1ac   :  { %v76_v53 = vrot.slane %v75_v52, 1 }
 0x1ae   :  { %v77_v54 = vadd.f32 %v76_v53, %v75_v52 }
 0x1b0   :  { %290 = vpush %v77_v54 }
 0x1b2   :  { %v309_v37 = vpop.eup %308 }
 0x1b3   :  { %v311_v39 = vpop.eup %310  ;;  %v191_v40 = vsel %vm190_vm10, %v309_v37, 0.0  ;;  %v217_v41 = vsel %vm216_vm12, %v309_v37, 0.0  ;;  %v204_v44 = vsel %vm203_vm13, %v309_v37, 0.0 }
 0x1b4   :  { %v192_v42 = vsel %vm166_vm2, %v191_v40, 0.0  ;;  %v218_v43 = vsel %vm166_vm2, %v217_v41, 0.0  ;;  %v239_v45 = vsub.f32 %v236_v38, %v311_v39  ;;  %v205_v46 = vsel %vm166_vm2, %v204_v44, 0.0 }
 0x1b5   :  { %193 = vadd.xlane.f32.xlu1 %v192_v42  ;;  %219 = vadd.xlane.f32.xlu0 %v218_v43 }
 0x1b6   :  { %v241_v47 = vsel %vm240_vm14, %v239_v45, 0.0 }
 0x1b9   :  { %206 = vadd.xlane.f32.xlu1 %v205_v46 }
 0x1bd   :  { %242 = vadd.xlane.f32.xlu1 %v241_v47 }
 0x1e1   :  { %s477_s2 = spop %290 }
 0x1e2   :  { %s86_s21 = smul.f32 0.00048828125, %s477_s2 }
 0x1e4   :  { %261 = sst [smem:[#allocation9 + $0x1]] %s86_s21  ;;  %s253_s7 = smul.f32 5.0, %s86_s21 }
 0x242   :  { %v194_v55 = vpop.xlane.xlu1 %193  ;;  %v220_v56 = vpop.xlane.xlu0 %219 }
 0x243   :  { %v195_v57 = vrot.slane %v194_v55, 4  ;;  %v221_v58 = vrot.slane %v220_v56, 4 }
 0x245   :  { %v196_v59 = vadd.f32 %v195_v57, %v194_v55  ;;  %v222_v60 = vadd.f32 %v221_v58, %v220_v56 }
 0x246   :  { %v207_v61 = vpop.xlane.xlu1 %206 }
 0x247   :  { %v197_v62 = vrot.slane %v196_v59, 2  ;;  %v223_v63 = vrot.slane %v222_v60, 2  ;;  %v208_v0 = vrot.slane %v207_v61, 4 }
 0x249   :  { %v209_v1 = vadd.f32 %v208_v0, %v207_v61  ;;  %v198_v2 = vadd.f32 %v197_v62, %v196_v59  ;;  %v224_v3 = vadd.f32 %v223_v63, %v222_v60 }
 0x24a   :  { %v243_v4 = vpop.xlane.xlu1 %242 }
 0x24b   :  { %v210_v5 = vrot.slane %v209_v1, 2  ;;  %v244_v6 = vrot.slane %v243_v4, 4  ;;  %v199_v7 = vrot.slane %v198_v2, 1  ;;  %v225_v11 = vrot.slane %v224_v3, 1 }
 0x24d   :  { %v245_v8 = vadd.f32 %v244_v6, %v243_v4  ;;  %v200_v9 = vadd.f32 %v199_v7, %v198_v2  ;;  %v211_v10 = vadd.f32 %v210_v5, %v209_v1  ;;  %v226_v16 = vadd.f32 %v225_v11, %v224_v3 }
 0x24f   :  { %v246_v12 = vrot.slane %v245_v8, 2  ;;  %292 = vpush %v200_v9  ;;  %v212_v13 = vrot.slane %v211_v10, 1 }
 0x251   :  { %v247_v14 = vadd.f32 %v246_v12, %v245_v8  ;;  %v213_v15 = vadd.f32 %v212_v13, %v211_v10 }
 0x253   :  { %294 = vpush %v213_v15  ;;  %v248_v17 = vrot.slane %v247_v14, 1 }
 0x254   :  { %296 = vpush %v226_v16 }
 0x255   :  { %v249_v18 = vadd.f32 %v248_v17, %v247_v14 }
 0x257   :  { %298 = vpush %v249_v18 }
 0x280   :  { %s293_s22 = spop %292 }
 0x281   :  { %s202_s23 = smul.f32 0.25, %s293_s22 }
 0x284   :  { %s295_s24 = spop %294 }
 0x285   :  { %s215_s25 = smul.f32 0.25, %s295_s24  ;;  %s297_s26 = spop %296 }
 0x286   :  { %s228_s27 = smul.f32 0.25, %s297_s26 }
 0x287   :  { %s229_s28 = sadd.f32 %s215_s25, %s202_s23 }
 0x288   :  { %s230_s29 = smul.f32 2.0, %s228_s27  ;;  %s299_s30 = spop %298 }
 0x289   :  { %s251_s4 = smul.f32 -0.5, %s299_s30 }
 0x28a   :  { %s231_s5 = ssub.f32 %s229_s28, %s230_s29 }
 0x28b   :  { %s252_s6 = smul.f32 0.5, %s251_s4 }
 0x28c   :  { %263 = sst [smem:[#allocation9 + $0x2]] %s231_s5  ;;  %s256_s9 = smul.f32 49.25, %s231_s5 }
 0x28d   :  { %s254_s8 = smul.f32 0.75, %s252_s6  ;;  %s264_s1 = ssub.f32 0.0, %s252_s6 }
 0x28f   :  { %s255_s10 = sadd.f32 %s254_s8, %s253_s7 }
 0x290   :  { %266 = sst [smem:[#allocation9 + $0x3]] %s264_s1 }
 0x291   :  { %s257_s11 = sadd.f32 %s256_s9, %s255_s10 }
 0x293   :  { %259 = sst [smem:[#allocation9]] %s257_s11 }
 0x294   :  { %387 = shalt.err (!%p384_p12)
}
 0x295   :  { %s401_s20 = smov [#allocation9]  }
 0x296   :  { %274 = dma.smem_to_hbm %s401_s20, 16, %s499_s3, [#allocation5]  }
 0x297   :  { %392 = dma.done.wait [#allocation5], 16  }
 0x298   :  { %393 = vsyncadd [#allocation5], 4294967280 }
 0x299   :  { %278 = sfence }
 0x29a   :  { %279 = vsyncpa [#allocation4], 1 }
 0x29b   :  { %280 = vsyncpa [#allocation7], 1 }
 0x29c   :  { %281 = vsyncpa [#allocation5], 1 }

</bundles_post_ra>
